<compile_context>
chip_gen: v7x
topology: tpu7x:2x2x1
jax: 0.10.0
libtpu: 0.0.40
codegen_flags: <defaults>
</compile_context>

<pallas_src>
import numpy as np
import jax
import jax.numpy as jnp
from jax import lax
from jax.experimental import pallas as pl
from jax.experimental.pallas import tpu as pltpu

_LANE = 128
_SUBLANE = 8


def _make_kernel(rows: int, block_rows: int, blocks_per_half: int,
                 any_partial: bool):
    """Builds the kernel with the static block geometry baked in."""

    def kernel(x_ref, out_ref):
        i = pl.program_id(1)

        @pl.when(i == 0)
        def _():
            out_ref[...] = jnp.zeros_like(out_ref)

        # x_ref block: (2, block_rows, 128) in native dtype; upcast in-vreg and
        # take |input[0] - input[1]| (== sqrt(square(diff))).
        a = x_ref[0].astype(jnp.float32)
        b = x_ref[1].astype(jnp.float32)
        absdiff = jnp.abs(a - b)                        # (block_rows, 128) f32

        def fold(v):
            # Sublane-aligned fold (block_rows,128) -> (8,128): pure vreg-wise
            # VPU adds, no cross-lane reduce in the hot loop.
            return jnp.sum(
                v.reshape(block_rows // _SUBLANE, _SUBLANE, _LANE), axis=0)

        if not any_partial:
            # Every block is full: no masking work compiled in at all.
            out_ref[...] += fold(absdiff)[None]
        else:
            c = pl.program_id(0)
            blk = c * blocks_per_half + i               # unclamped global blk
            valid = rows - blk * block_rows             # valid rows in blk

            @pl.when(valid >= block_rows)               # common path: no mask
            def _():
                out_ref[...] += fold(absdiff)[None]

            @pl.when(valid < block_rows)                # tail / phantom block
            def _():
                row_ids = lax.broadcasted_iota(
                    jnp.int32, (block_rows, _LANE), 0)
                out_ref[...] += fold(
                    jnp.where(row_ids < valid, absdiff, 0.0))[None]

    return kernel


def _abs_diff_sum_jnp(pair):
    return jnp.sum(jnp.abs(pair[0].astype(jnp.float32) -
                           pair[1].astype(jnp.float32)))


def discriminate_loss(x, label, *, block_bytes=4 << 20):
    """x: (2, ...) float array (e.g. (2, C, H, W)); label: (2,) ints.

    Returns a scalar float32 loss (the module has no learnable parameters).
    block_bytes: per-step DMA budget; 4 MiB is a good default on all chips,
    v6e/v7x can use 8 MiB (keep ~2-4 MiB on v5e).
    """
    if label.shape[0] != 2:
        # Static shape branch, same as PyTorch's `label.shape[0] == 2` check.
        # TODO(synk): torch.tensor(0) is int64; we return float32 0 for dtype
        # consistency with the loss path.
        return jnp.float32(0.0)

    n_valid = int(np.prod(x.shape[1:]))
    xf = jnp.reshape(x, (2, n_valid))                    # free reshape

    rem = n_valid % _LANE
    n_main = n_valid - rem
    rows = n_main // _LANE

    total = jnp.float32(0.0)

    if rows < 4 * _SUBLANE:
        # Tiny input (< 32*128 elements): a kernel launch isn't worth it.
        total = _abs_diff_sum_jnp(xf)
        n_main = 0
    elif rem:
        # <=127-element misaligned remainder: reduce it with plain jnp instead
        # of jnp.pad-ing (and re-reading) the whole array.
        total = _abs_diff_sum_jnp(xf[:, n_main:])

    if n_main > 0:
        # TODO(synk): when rem != 0 the slice below still materializes a copy
        # of the main part; a memory_space=pl.ANY manual-DMA path would make
        # the misaligned case fully copy-free as well.
        x_main = xf if rem == 0 else xf[:, :n_main]
        x_main = jnp.reshape(x_main, (2, rows, _LANE))   # lane/sublane dense

        itemsize = int(np.dtype(x.dtype).itemsize)
        # Block sized by byte budget (not rows); multiple of 32 rows so bf16
        # (16,128) / int8-fp8 (32,128) sublane packing stays aligned.
        budget_rows = max(
            32, (int(block_bytes) // (2 * _LANE * itemsize)) // 32 * 32)
        block_rows = min(budget_rows, max(32, (rows // 32) * 32))

        nblocks = -(-rows // block_rows)
        n_split = 2 if nblocks >= 2 else 1        # v7x: one half per TC
        blocks_per_half = -(-nblocks // n_split)
        any_partial = (rows % block_rows != 0) or (
            n_split * blocks_per_half != nblocks)
        last_block = nblocks - 1

        # Double-buffered native-dtype input + f32 intermediates + margin.
        vmem_limit = (2 * (2 * block_rows * _LANE * itemsize)
                      + 4 * (block_rows * _LANE * 4) + (2 << 20))
        vmem_limit = max(int(vmem_limit), 32 << 20)

        partials = pl.pallas_call(
            _make_kernel(rows, block_rows, blocks_per_half, any_partial),
            out_shape=jax.ShapeDtypeStruct((n_split, _SUBLANE, _LANE),
                                           jnp.float32),
            grid_spec=pltpu.PrefetchScalarGridSpec(
                num_scalar_prefetch=0,
                grid=(n_split, blocks_per_half),
                in_specs=[pl.BlockSpec(
                    (2, block_rows, _LANE),
                    # Clamp so phantom blocks (odd nblocks split 2-way) issue
                    # an in-bounds DMA; their contribution is masked to 0.
                    lambda c, i: (0, jnp.minimum(c * blocks_per_half + i,
                                                 last_block), 0))],
                out_specs=pl.BlockSpec((1, _SUBLANE, _LANE),
                                       lambda c, i: (c, 0, 0)),
            ),
            compiler_params=pltpu.CompilerParams(
                dimension_semantics=("parallel", "arbitrary"),
                vmem_limit_bytes=int(vmem_limit)),
        )(x_main)

        total = total + jnp.sum(partials)

    # Epilogue (mean + label branch) in plain jnp: one scalar log/exp in XLA.
    mmse = total / jnp.float32(n_valid)
    same = label[0] == label[1]
    # NOTE: -log(1 - mmse) is NaN/Inf when mmse >= 1 (matches PyTorch).
    return jnp.where(same, -jnp.log(jnp.float32(1.0) - mmse), jnp.exp(-mmse))


def _reference(x, label):
    """Pure-JAX reference mirroring the PyTorch forward."""
    if label.shape[0] != 2:
        return jnp.float32(0.0)
    mmse = jnp.mean(jnp.abs(x[0].astype(jnp.float32) -
                            x[1].astype(jnp.float32)))
    return jnp.where(label[0] == label[1], -jnp.log(1.0 - mmse),
                     jnp.exp(-mmse))


if __name__ == "__main__":
    key = jax.random.PRNGKey(0)
    k1, k2, k3 = jax.random.split(key, 3)

    label_same = jnp.array([3, 3], dtype=jnp.int32)
    label_diff = jnp.array([3, 7], dtype=jnp.int32)

    # Case 1/2: 1024-aligned f32 (zero-copy path, single block). Values kept
    # small so 1 - mean(|diff|) stays positive for the -log branch.
    x = 0.1 * jax.random.normal(k1, (2, 8, 32, 32), dtype=jnp.float32)
    for lbl in (label_same, label_diff):
        out = jax.block_until_ready(discriminate_loss(x, lbl))
        ref = jax.block_until_ready(_reference(x, lbl))
        np.testing.assert_allclose(np.asarray(out), np.asarray(ref),
                                   rtol=1e-5, atol=1e-6)

    # Case 3: misaligned size (7585 = 59*128 + 33): jnp remainder + 2-way core
    # split with a partial tail block (27 valid rows) handled in-kernel.
    x_odd = 0.1 * jax.random.normal(k2, (2, 5, 37, 41), dtype=jnp.float32)
    out = jax.block_until_ready(discriminate_loss(x_odd, label_same))
    ref = jax.block_until_ready(_reference(x_odd, label_same))
    np.testing.assert_allclose(np.asarray(out), np.asarray(ref),
                               rtol=1e-5, atol=1e-6)

    # Case 4: small block budget -> 3 real blocks split over the 2-way parallel
    # axis with one phantom (fully masked) block.
    x_multi = 0.1 * jax.random.normal(k3, (2, 4, 48, 64), dtype=jnp.float32)
    out = jax.block_until_ready(
        discriminate_loss(x_multi, label_diff, block_bytes=32 * 1024))
    ref = jax.block_until_ready(_reference(x_multi, label_diff))
    np.testing.assert_allclose(np.asarray(out), np.asarray(ref),
                               rtol=1e-5, atol=1e-6)

    # Case 5: bf16 streamed natively (no wrapper upcast).
    x_bf16 = x.astype(jnp.bfloat16)
    out = jax.block_until_ready(discriminate_loss(x_bf16, label_diff))
    ref = jax.block_until_ready(_reference(x_bf16, label_diff))
    np.testing.assert_allclose(np.asarray(out), np.asarray(ref),
                               rtol=1e-3, atol=1e-4)

    # Case 6: tiny input -> pure-jnp path (no kernel launch).
    x_tiny = 0.1 * jax.random.normal(k1, (2, 4, 4, 4), dtype=jnp.float32)
    out = jax.block_until_ready(discriminate_loss(x_tiny, label_same))
    ref = jax.block_until_ready(_reference(x_tiny, label_same))
    np.testing.assert_allclose(np.asarray(out), np.asarray(ref),
                               rtol=1e-5, atol=1e-6)

    # Case 7: label.shape[0] != 2 -> 0 (static branch).
    assert float(discriminate_loss(x, jnp.array([1, 2, 3], jnp.int32))) == 0.0

    print("KERNEL_OK")
</pallas_src>

<mosaic_0001>
module attributes {stable_mosaic.version = 11 : i64} {
  func.func @kernel(%arg0: i32, %arg1: i32, %arg2: memref<2x64x128xf32, #tpu.memory_space<vmem>>, %arg3: memref<1x8x128xf32, #tpu.memory_space<vmem>>) attributes {dimension_semantics = [#tpu.dimension_semantics<parallel>, #tpu.dimension_semantics<arbitrary>], iteration_bounds = array<i64: 1, 1>, scalar_prefetch = 0 : i64, scratch_operands = 0 : i64, tpu.core_type = #tpu.core_type<tc>, window_params = [{transform_indices = @transform_0, window_bounds = array<i64: 2, 64, 128>}, {transform_indices = @transform_1, window_bounds = array<i64: 1, 8, 128>}]} {
    %c0_i32 = arith.constant 0 : i32
    %0 = arith.cmpi eq, %arg1, %c0_i32 : i32
    %1 = arith.extui %0 : i1 to i32
    %c0_i32_0 = arith.constant 0 : i32
    %2 = arith.cmpi ne, %1, %c0_i32_0 : i32
    scf.if %2 {
      %cst_11 = arith.constant 0.000000e+00 : f32
      %15 = vector.broadcast %cst_11 : f32 to vector<1x8x128xf32>
      %c0_12 = arith.constant 0 : index
      %c0_13 = arith.constant 0 : index
      %c0_14 = arith.constant 0 : index
      %16 = vector.load %arg3[%c0_12, %c0_13, %c0_14] : memref<1x8x128xf32, #tpu.memory_space<vmem>>, vector<1x8x128xf32>
      tpu.vector_store %arg3[%c0_12, %c0_13, %c0_14], %15 {strides = array<i32>} : memref<1x8x128xf32, #tpu.memory_space<vmem>>, vector<1x8x128xf32>,
    } else {
    }
    %c0 = arith.constant 0 : index
    %c0_1 = arith.constant 0 : index
    %c0_2 = arith.constant 0 : index
    %3 = vector.load %arg2[%c0, %c0_1, %c0_2] : memref<2x64x128xf32, #tpu.memory_space<vmem>>, vector<1x64x128xf32>
    %4 = vector.shape_cast %3 : vector<1x64x128xf32> to vector<64x128xf32>
    %c1 = arith.constant 1 : index
    %c0_3 = arith.constant 0 : index
    %c0_4 = arith.constant 0 : index
    %5 = vector.load %arg2[%c1, %c0_3, %c0_4] : memref<2x64x128xf32, #tpu.memory_space<vmem>>, vector<1x64x128xf32>
    %6 = vector.shape_cast %5 : vector<1x64x128xf32> to vector<64x128xf32>
    %7 = arith.subf %4, %6 : vector<64x128xf32>
    %8 = math.absf %7 : vector<64x128xf32>
    %c0_5 = arith.constant 0 : index
    %c0_6 = arith.constant 0 : index
    %c0_7 = arith.constant 0 : index
    %9 = vector.load %arg3[%c0_5, %c0_6, %c0_7] : memref<1x8x128xf32, #tpu.memory_space<vmem>>, vector<1x8x128xf32>
    %10 = vector.shape_cast %8 : vector<64x128xf32> to vector<8x8x128xf32>
    %cst = arith.constant dense<0.000000e+00> : vector<8x128xf32>
    %11 = vector.multi_reduction <add>, %10, %cst [0] : vector<8x8x128xf32> to vector<8x128xf32>
    %12 = vector.shape_cast %11 : vector<8x128xf32> to vector<1x8x128xf32>
    %13 = arith.addf %9, %12 : vector<1x8x128xf32>
    %c0_8 = arith.constant 0 : index
    %c0_9 = arith.constant 0 : index
    %c0_10 = arith.constant 0 : index
    %14 = vector.load %arg3[%c0_8, %c0_9, %c0_10] : memref<1x8x128xf32, #tpu.memory_space<vmem>>, vector<1x8x128xf32>
    tpu.vector_store %arg3[%c0_8, %c0_9, %c0_10], %13 {strides = array<i32>} : memref<1x8x128xf32, #tpu.memory_space<vmem>>, vector<1x8x128xf32>,
    return
  }
  func.func @transform_0(%arg0: i32, %arg1: i32) -> (i32, i32, i32) {
    %c1_i32 = arith.constant 1 : i32
    %0 = arith.muli %arg0, %c1_i32 : i32
    %1 = arith.addi %0, %arg1 : i32
    %c0_i32 = arith.constant 0 : i32
    %2 = arith.minsi %1, %c0_i32 : i32
    %c0_i32_0 = arith.constant 0 : i32
    %c0_i32_1 = arith.constant 0 : i32
    %c0_i32_2 = arith.constant 0 : i32
    return %c0_i32_0, %2, %c0_i32_1 : i32, i32, i32
  }
  func.func @transform_1(%arg0: i32, %arg1: i32) -> (i32, i32, i32) {
    %c0_i32 = arith.constant 0 : i32
    %c0_i32_0 = arith.constant 0 : i32
    %c0_i32_1 = arith.constant 0 : i32
    return %arg0, %c0_i32, %c0_i32_0 : i32, i32, i32
  }
}

</mosaic_0001>

<bundles_post_ra>
// kernel: tpu_custom_call.1
= control target key start
LH: loop header
LB: loop body
LE: loop exit
PB: predicated region body
PF: predicated region fallthrough
CT: control target
= control target key end

     0   :  { %6 = vsyncpa [#allocation3], 0  ;;  %s189_s0 = inlined_call_operand.hbm [shape: f32[2,64,128], index: 0, kind: input, shape index: {}]   ;;  %s190_s1 = inlined_call_operand.hbm [shape: f32[1,8,128], index: 1, kind: output, shape index: {}]  }
   0x1   :  { %7 = vsyncpa [#allocation4], 0  ;;  %s151_s6 = smov [#allocation2]   ;;  %s103_s10 = scalar_lea.hbm %s189_s0, 2048 }
   0x2   :  { %s19_s7 = sshll.u32 %s151_s6, 4  ;;  %p104_p0 = scmp.ne.s32.totalorder %s189_s0, %s103_s10  ;;  %s20_s7 = int_to_ptr.vmem [resolvable:$true] %s19_s7 }
   0x3   :  { %p107_p1 = scmp.lt.u32.totalorder %s103_s10, %s189_s0 }
   0x5   :  { %p109_p2 = pnand %p107_p1, %p104_p0 }
   0x7   :  { %112 = shalt.err (!%p109_p2)
}
   0x8   :  { %s113_s15 = scalar_lea.vmem %s20_s7, 2048  ;;  %p118_p4 = scmp.lt.s32.totalorder %s20_s7, %s20_s7 }
   0x9   :  { %p114_p3 = scmp.ne.s32.totalorder %s20_s7, %s113_s15  ;;  %p119_p5 = scmp.lt.s32.totalorder %s113_s15, %s113_s15 }
   0xb   :  { %p120_p6 = por %p119_p5, %p118_p4 }
   0xd   :  { %p121_p7 = pnand %p120_p6, %p114_p3 }
   0xf   :  { %124 = shalt.err (!%p121_p7)
}
  0x10   :  { %s152_s16 = smov 128   ;;  %s153_s17 = smov 8  }
  0x11   :  { %25 = dma.hbm_to_vmem [thread:$0]  %s189_s0, 2048, %s20_s7, [#allocation3], %s152_s16, %s152_s16, %s153_s17  }
  0x12   :  { %147 = dma.done.wait [#allocation3], 2048  }
  0x13   :  { %148 = vsyncadd [#allocation3], 4294965248  ;;  %v38_v0 = vld [vmem:[#allocation2] sm:$0xff]  ;;  %v39_v1 = vld [vmem:[#allocation2 + $0x8] sm:$0xff]  ;;  %s154_s0 = smov [#allocation5]  }
  0x14   :  { %v40_v2 = vld [vmem:[#allocation2 + $0x10] sm:$0xff]  ;;  %v41_v3 = vld [vmem:[#allocation2 + $0x18] sm:$0xff]  ;;  %v42_v4 = vld [vmem:[#allocation2 + $0x20] sm:$0xff]  ;;  %s87_s20 = sshll.u32 %s154_s0, 4  ;;  %s88_s20 = int_to_ptr.vmem [resolvable:$true] %s87_s20 }
  0x15   :  { %v47_v5 = vld [vmem:[#allocation2 + $0x40] sm:$0xff]  ;;  %v48_v6 = vld [vmem:[#allocation2 + $0x48] sm:$0xff]  ;;  %v49_v7 = vld [vmem:[#allocation2 + $0x50] sm:$0xff]  ;;  %s125_s21 = scalar_lea.vmem %s88_s20, 128  ;;  %p130_p9 = scmp.lt.s32.totalorder %s88_s20, %s88_s20 }
  0x16   :  { %v50_v8 = vld [vmem:[#allocation2 + $0x58] sm:$0xff]  ;;  %v55_v9 = vsub.f32 %v38_v0, %v47_v5  ;;  %v51_v10 = vld [vmem:[#allocation2 + $0x60] sm:$0xff]  ;;  %v56_v11 = vsub.f32 %v39_v1, %v48_v6  ;;  %v57_v12 = vsub.f32 %v40_v2, %v49_v7  ;;  %v43_v14 = vld [vmem:[#allocation2 + $0x28] sm:$0xff]  ;;  %p126_p8 = scmp.ne.s32.totalorder %s88_s20, %s125_s21  ;;  %p131_p10 = scmp.lt.s32.totalorder %s125_s21, %s125_s21 }
  0x17   :  { %v58_v13 = vsub.f32 %v41_v3, %v50_v8  ;;  %v52_v15 = vld [vmem:[#allocation2 + $0x68] sm:$0xff]  ;;  %v59_v17 = vsub.f32 %v42_v4, %v51_v10  ;;  %v44_v20 = vld [vmem:[#allocation2 + $0x30] sm:$0xff]  ;;  %v45_v25 = vld [vmem:[#allocation2 + $0x38] sm:$0xff] }
  0x18   :  { %v63_v16 = vand.u32 2147483647, %v55_v9  ;;  %v64_v18 = vand.u32 2147483647, %v56_v11  ;;  %v65_v19 = vand.u32 2147483647, %v57_v12  ;;  %v60_v22 = vsub.f32 %v43_v14, %v52_v15  ;;  %p132_p11 = por %p131_p10, %p130_p9 }
  0x19   :  { %v53_v21 = vld [vmem:[#allocation2 + $0x70] sm:$0xff]  ;;  %v66_v23 = vand.u32 2147483647, %v58_v13  ;;  %v54_v26 = vld [vmem:[#allocation2 + $0x78] sm:$0xff]  ;;  %v67_v28 = vand.u32 2147483647, %v59_v17 }
  0x1a   :  { %v72_v24 = vadd.f32 %v64_v18, %v63_v16  ;;  %v61_v27 = vsub.f32 %v44_v20, %v53_v21  ;;  %v62_v30 = vsub.f32 %v45_v25, %v54_v26  ;;  %v68_v31 = vand.u32 2147483647, %v60_v22  ;;  %p133_p12 = pnand %p132_p11, %p126_p8 }
  0x1c   :  { %v73_v29 = vadd.f32 %v72_v24, %v65_v19  ;;  %v69_v33 = vand.u32 2147483647, %v61_v27  ;;  %v70_v35 = vand.u32 2147483647, %v62_v30 }
  0x1e   :  { %v74_v32 = vadd.f32 %v73_v29, %v66_v23 }
  0x20   :  { %v75_v34 = vadd.f32 %v74_v32, %v67_v28 }
  0x22   :  { %v76_v36 = vadd.f32 %v75_v34, %v68_v31 }
  0x24   :  { %v77_v37 = vadd.f32 %v76_v36, %v69_v33 }
  0x26   :  { %v78_v38 = vadd.f32 %v77_v37, %v70_v35 }
  0x28   :  { %80 = vst [vmem:[#allocation5] sm:$0xff] %v78_v38 }
  0x29   :  { %136 = shalt.err (!%p133_p12)
}
  0x2a   :  { %s137_s24 = scalar_lea.hbm %s190_s1, 128 }
  0x2b   :  { %p138_p13 = scmp.ne.s32.totalorder %s190_s1, %s137_s24  ;;  %p141_p0 = scmp.lt.u32.totalorder %s137_s24, %s190_s1 }
  0x2d   :  { %p143_p1 = pnand %p141_p0, %p138_p13 }
  0x2f   :  { %146 = shalt.err (!%p143_p1)
}
  0x30   :  { %90 = dma.vmem_to_hbm [thread:$0]  %s88_s20, 128, %s190_s1, [#allocation4]  }
  0x31   :  { %149 = dma.done.wait [#allocation4], 128  }
  0x32   :  { %150 = vsyncadd [#allocation4], 4294967168 }
  0x33   :  { %94 = vsyncpa [#allocation3], 1 }
  0x34   :  { %95 = vsyncpa [#allocation4], 1 }

</bundles_post_ra>
